<compile_context>
chip_gen: v7x
topology: tpu7x:2x2x1
jax: 0.10.0
libtpu: 0.0.40
codegen_flags: <defaults>
</compile_context>

<pallas_src>
import math

import jax
import jax.numpy as jnp
from jax.experimental import pallas as pl
from jax.experimental.pallas import tpu as pltpu


def _concat_kernel(*refs):
    """refs = (x_0, ..., x_{n-1}, out).

    Each x_i block has shape (C_i, TW); the output block is (sum(C_i), TW).
    Static channel offsets -> plain VMEM copies, no compute.
    """
    o_ref = refs[-1]
    off = 0
    for x_ref in refs[:-1]:
        c = x_ref.shape[0]
        o_ref[off:off + c, :] = x_ref[...]
        off += c


def _pick_inner_tile(inner, c_total, itemsize, budget_bytes=2 << 20):
    """Largest multiple-of-128 divisor of `inner` whose output block fits budget."""
    if inner % 128 != 0:
        # Full-extent last dim is always a legal block; small shapes only.
        return inner
    best = None
    tw = 128
    while tw <= inner:
        if inner % tw == 0 and tw * c_total * itemsize <= budget_bytes:
            best = tw
        tw += 128
    return best if best is not None else 128


def concat(xs, dim=1):
    """Pallas TPU equivalent of torch.cat(xs, dim). Default dim=1 (channels)."""
    xs = list(xs)
    assert len(xs) >= 1
    nd = xs[0].ndim
    dim = dim % nd
    ref_shape = xs[0].shape
    for x in xs:
        assert x.ndim == nd
        assert x.shape[:dim] == ref_shape[:dim]
        assert x.shape[dim + 1:] == ref_shape[dim + 1:]

    out_dtype = jnp.result_type(*[x.dtype for x in xs])
    sizes = [int(x.shape[dim]) for x in xs]
    c_total = sum(sizes)
    outer = int(math.prod(ref_shape[:dim]))
    inner = int(math.prod(ref_shape[dim + 1:]))

    # Contiguous 3-D views (no data movement).
    xs3 = [x.astype(out_dtype).reshape(outer, c, inner) for x, c in zip(xs, sizes)]

    itemsize = jnp.dtype(out_dtype).itemsize
    tw = _pick_inner_tile(inner, c_total, itemsize)
    grid = (outer, inner // tw)

    in_specs = [
        pl.BlockSpec((None, c, tw), lambda b, s: (b, 0, s))  # batch dim squeezed
        for c in sizes
    ]
    out_spec = pl.BlockSpec((None, c_total, tw), lambda b, s: (b, 0, s))

    total_bytes = sum(int(x.size) * itemsize for x in xs3)

    out3 = pl.pallas_call(
        _concat_kernel,
        out_shape=jax.ShapeDtypeStruct((outer, c_total, inner), out_dtype),
        grid_spec=pltpu.PrefetchScalarGridSpec(
            num_scalar_prefetch=0,
            grid=grid,
            in_specs=in_specs,
            out_specs=out_spec,
        ),
        compiler_params=pltpu.CompilerParams(
            dimension_semantics=("parallel", "parallel"),
            vmem_limit_bytes=32 * 1024 * 1024,
        ),
        cost_estimate=pl.CostEstimate(
            flops=0, transcendentals=0, bytes_accessed=2 * total_bytes),
    )(*xs3)

    out_shape = ref_shape[:dim] + (c_total,) + ref_shape[dim + 1:]
    return out3.reshape(out_shape)


if __name__ == "__main__":
    key = jax.random.PRNGKey(0)

    # --- test 1: typical YOLO-style channel concat, lane-dense spatial (16x16) ---
    shapes = [(2, 4, 16, 16), (2, 8, 16, 16), (2, 16, 16, 16)]
    xs = []
    for s in shapes:
        key, k = jax.random.split(key)
        xs.append(jax.random.normal(k, s, dtype=jnp.float32))

    out = concat(xs, dim=1)
    out = jax.block_until_ready(out)
    ref = jnp.concatenate(xs, axis=1)
    assert out.shape == (2, 28, 16, 16)
    assert jnp.array_equal(out, ref)

    # --- test 2: spatial size not a multiple of 128 (full-extent lane block) ---
    shapes2 = [(2, 8, 10, 10), (2, 24, 10, 10)]
    xs2 = []
    for s in shapes2:
        key, k = jax.random.split(key)
        xs2.append(jax.random.normal(k, s, dtype=jnp.float32))

    out2 = jax.block_until_ready(concat(xs2, dim=1))
    assert jnp.array_equal(out2, jnp.concatenate(xs2, axis=1))

    print("KERNEL_OK")
</pallas_src>

<mosaic_0001>
module attributes {stable_mosaic.version = 11 : i64} {
  func.func @_concat_kernel(%arg0: i32, %arg1: i32, %arg2: memref<1x4x256xf32, #tpu.memory_space<vmem>>, %arg3: memref<1x8x256xf32, #tpu.memory_space<vmem>>, %arg4: memref<1x16x256xf32, #tpu.memory_space<vmem>>, %arg5: memref<1x28x256xf32, #tpu.memory_space<vmem>>) attributes {dimension_semantics = [#tpu.dimension_semantics<parallel>, #tpu.dimension_semantics<parallel>], iteration_bounds = array<i64: 2, 1>, scalar_prefetch = 0 : i64, scratch_operands = 0 : i64, tpu.core_type = #tpu.core_type<tc>, window_params = [{transform_indices = @transform_0, window_bounds = array<i64: 1, 4, 256>}, {transform_indices = @transform_1, window_bounds = array<i64: 1, 8, 256>}, {transform_indices = @transform_2, window_bounds = array<i64: 1, 16, 256>}, {transform_indices = @transform_3, window_bounds = array<i64: 1, 28, 256>}]} {
    %c0 = arith.constant 0 : index
    %c0_0 = arith.constant 0 : index
    %c0_1 = arith.constant 0 : index
    %0 = vector.load %arg2[%c0, %c0_0, %c0_1] : memref<1x4x256xf32, #tpu.memory_space<vmem>>, vector<1x4x256xf32>
    %1 = vector.shape_cast %0 : vector<1x4x256xf32> to vector<4x256xf32>
    %c0_2 = arith.constant 0 : index
    %c0_3 = arith.constant 0 : index
    %c0_4 = arith.constant 0 : index
    %2 = vector.load %arg5[%c0_2, %c0_3, %c0_4] : memref<1x28x256xf32, #tpu.memory_space<vmem>>, vector<1x4x256xf32>
    %3 = vector.shape_cast %2 : vector<1x4x256xf32> to vector<4x256xf32>
    %4 = vector.shape_cast %1 : vector<4x256xf32> to vector<1x4x256xf32>
    tpu.vector_store %arg5[%c0_2, %c0_3, %c0_4], %4 {strides = array<i32>} : memref<1x28x256xf32, #tpu.memory_space<vmem>>, vector<1x4x256xf32>,
    %c0_5 = arith.constant 0 : index
    %c0_6 = arith.constant 0 : index
    %c0_7 = arith.constant 0 : index
    %5 = vector.load %arg3[%c0_5, %c0_6, %c0_7] : memref<1x8x256xf32, #tpu.memory_space<vmem>>, vector<1x8x256xf32>
    %6 = vector.shape_cast %5 : vector<1x8x256xf32> to vector<8x256xf32>
    %c0_8 = arith.constant 0 : index
    %c4 = arith.constant 4 : index
    %c0_9 = arith.constant 0 : index
    %7 = vector.load %arg5[%c0_8, %c4, %c0_9] : memref<1x28x256xf32, #tpu.memory_space<vmem>>, vector<1x8x256xf32>
    %8 = vector.shape_cast %7 : vector<1x8x256xf32> to vector<8x256xf32>
    %9 = vector.shape_cast %6 : vector<8x256xf32> to vector<1x8x256xf32>
    tpu.vector_store %arg5[%c0_8, %c4, %c0_9], %9 {strides = array<i32>} : memref<1x28x256xf32, #tpu.memory_space<vmem>>, vector<1x8x256xf32>,
    %c0_10 = arith.constant 0 : index
    %c0_11 = arith.constant 0 : index
    %c0_12 = arith.constant 0 : index
    %10 = vector.load %arg4[%c0_10, %c0_11, %c0_12] : memref<1x16x256xf32, #tpu.memory_space<vmem>>, vector<1x16x256xf32>
    %11 = vector.shape_cast %10 : vector<1x16x256xf32> to vector<16x256xf32>
    %c0_13 = arith.constant 0 : index
    %c12 = arith.constant 12 : index
    %c0_14 = arith.constant 0 : index
    %12 = vector.load %arg5[%c0_13, %c12, %c0_14] : memref<1x28x256xf32, #tpu.memory_space<vmem>>, vector<1x16x256xf32>
    %13 = vector.shape_cast %12 : vector<1x16x256xf32> to vector<16x256xf32>
    %14 = vector.shape_cast %11 : vector<16x256xf32> to vector<1x16x256xf32>
    tpu.vector_store %arg5[%c0_13, %c12, %c0_14], %14 {strides = array<i32>} : memref<1x28x256xf32, #tpu.memory_space<vmem>>, vector<1x16x256xf32>,
    return
  }
  func.func @transform_0(%arg0: i32, %arg1: i32) -> (i32, i32, i32) {
    %c0_i32 = arith.constant 0 : i32
    %c0_i32_0 = arith.constant 0 : i32
    return %arg0, %c0_i32, %arg1 : i32, i32, i32
  }
  func.func @transform_1(%arg0: i32, %arg1: i32) -> (i32, i32, i32) {
    %c0_i32 = arith.constant 0 : i32
    %c0_i32_0 = arith.constant 0 : i32
    return %arg0, %c0_i32, %arg1 : i32, i32, i32
  }
  func.func @transform_2(%arg0: i32, %arg1: i32) -> (i32, i32, i32) {
    %c0_i32 = arith.constant 0 : i32
    %c0_i32_0 = arith.constant 0 : i32
    return %arg0, %c0_i32, %arg1 : i32, i32, i32
  }
  func.func @transform_3(%arg0: i32, %arg1: i32) -> (i32, i32, i32) {
    %c0_i32 = arith.constant 0 : i32
    %c0_i32_0 = arith.constant 0 : i32
    return %arg0, %c0_i32, %arg1 : i32, i32, i32
  }
}

</mosaic_0001>

<bundles_post_ra>
// kernel: tpu_custom_call.1
= control target key start
LH: loop header
LB: loop body
LE: loop exit
PB: predicated region body
PF: predicated region fallthrough
CT: control target
= control target key end

     0   :  { %8 = vsyncpa [#allocation3], 0  ;;  %s959_s0 = inlined_call_operand.hbm [shape: f32[2,4,256], index: 0, kind: input, shape index: {}]   ;;  %s960_s1 = inlined_call_operand.hbm [shape: f32[2,8,256], index: 1, kind: input, shape index: {}]   ;;  %s961_s2 = inlined_call_operand.hbm [shape: f32[2,16,256], index: 2, kind: input, shape index: {}]   ;;  %s962_s3 = inlined_call_operand.vmem [shape: f32[2,28,256], index: 3, kind: output, shape index: {}]  }
   0x1   :  { %10 = vsyncpa [#allocation3 + $0x1], 0 }
   0x2   :  { %11 = vsyncpa [#allocation5], 0 }
   0x3   :  { %13 = vsyncpa [#allocation5 + $0x1], 0  ;;  %s755_s12 = smov 0   ;;  %s757_s13 = smov 0  }
   0x4   :  { %s759_s14 = smov 0   ;;  %s761_s15 = smov 0  }
   0x5   :  { %s763_s16 = smov 0   ;;  %s765_s17 = smov 0  }
   0x6 LB: > { %s491_s18 = sadd.s32 4294967295, %s728_s17   ;;  %s31_s19 = sadd.s32 1, %s724_s16  ;;  %s728_s17 = sphi %s765_s17, %s19_s17   ;;  %s724_s16 = sphi %s763_s16, %s974_s16   ;;  %s720_s15 = sphi %s761_s15, %s973_s15   ;;  %s716_s14 = sphi %s759_s14, %s972_s14   ;;  %s712_s13 = sphi %s757_s13, %s971_s13   ;;  %s708_s12 = sphi %s755_s12, %s970_s12  }
   0x7   : > { %p33_p0 = scmp.ge.s32.totalorder %s31_s19, 2  ;;  %s40_s20 = sadd.s32 1, %s716_s14 }
   0x8   : > { %p47_p1 = scmp.ne.s32.totalorder %s716_s14, %s712_s13  ;;  %p48_p2 = scmp.eq.s32.totalorder %s728_s17, 0 }
   0x9   : > { %s976_s19 = smov (%p33_p0, %s31_s19), 0  ;;  %p53_p4 = scmp.ne.s32.totalorder %s712_s13, %s708_s12 }
   0xa   : > { %p49_p3 = por %p48_p2, %p47_p1  ;;  %s35_s21 = ssub.s32 %s724_s16, %s976_s19 }
   0xb   : > { %p54_p5 = scmp.eq.s32.totalorder %s491_s18, 0  ;;  %p38_p6 = scmp.eq.s32.totalorder %s35_s21, 0 }
   0xc   : > { %p532_p8 = scmp.lt.s32.totalorder %s728_s17, 2  ;;  %s805_s24 = sand.u32 1, %s716_s14  }
   0xd   : > { %p796_p7 = por %p54_p5, %p53_p4  ;;  %s182_s26 = sand.u32 1, %s728_s17  }
   0xe   : > { %s802_s23 = scalar_select %p38_p6, %s716_s14, %s40_s20  }
   0xf   : > { %s964_s22 = scalar_select %p796_p7, 1, 0 }
  0x10   : > { %p807_p9 = pnand %p532_p8, %p49_p3  ;;  %s498_s27 = sshll.u32 %s805_s24, 4 }
  0x11   : > { %s513_s28 = sshll.u32 %s724_s16, 8  ;;  %s186_s5 = scalar_lea.vmem [#allocation4], %s498_s27 }
  0x12   : > { %s817_s4 = scalar_lea.hbm %s960_s1, %s513_s28  ;;  %s196_s6 = sshll.u32 %s186_s5, 4  ;;  %s819_s6 = int_to_ptr.vmem [resolvable:$true] %s196_s6 }
  0x13   : > { %s501_s7 = sshll.u32 %s805_s24, 5  ;;  %s822_s8 = scalar_lea.sflag [#allocation5], %s182_s26 }
  0x14   : > { %s584_s9 = scalar_lea.hbm %s817_s4, 256  ;;  %p828_p11 = pneg %p807_p9 }
  0x15   : > { %p585_p10 = scmp.ne.s32.totalorder %s817_s4, %s584_s9  ;;  %s589_s20 = scalar_lea.hbm %s960_s1, 512 }
  0x16   : > { %p590_p0 = scmp.lt.u32.totalorder %s817_s4, %s960_s1  ;;  %p591_p1 = scmp.lt.u32.totalorder %s589_s20, %s584_s9 }
  0x17   : > { %p587_p12 = pnand %p828_p11, %p585_p10  ;;  %p593_p3 = scmp.lt.u32.totalorder %s584_s9, %s817_s4 }
  0x18   : > { %p592_p2 = por %p591_p1, %p590_p0 }
  0x19   : > { %p588_p13 = pneg %p587_p12 }
  0x1a   : > { %p594_p4 = por %p593_p3, %p592_p2 }
  0x1c   : > { %p595_p5 = pnand %p594_p4, %p588_p13 }
  0x1e   : > { %598 = shalt.err (!%p595_p5)
}
  0x1f   : > { %s599_s26 = scalar_lea.vmem %s819_s6, 256  ;;  %s730_s28 = smov [#allocation4]  }
  0x20   : > { %p600_p6 = scmp.ne.s32.totalorder %s819_s6, %s599_s26  ;;  %s604_s29 = sshll.u32 %s730_s28, 4  ;;  %s605_s29 = int_to_ptr.vmem [resolvable:$false] %s604_s29 }
  0x21   : > { %s606_s30 = scalar_lea.vmem %s605_s29, 512  ;;  %p607_p12 = scmp.lt.s32.totalorder %s819_s6, %s605_s29 }
  0x22   : > { %p602_p8 = pnand %p600_p6, %p828_p11  ;;  %p608_p7 = scmp.lt.s32.totalorder %s606_s30, %s599_s26 }
  0x24   : > { %p603_p10 = pneg %p602_p8  ;;  %p609_p0 = por %p608_p7, %p607_p12 }
  0x26   : > { %p610_p1 = pnand %p609_p0, %p603_p10 }
  0x28   : > { %613 = shalt.err (!%p610_p1)
}
  0x29   : > { %528 = dma.hbm_to_vmem [thread:$0]  (!%p807_p9), %s817_s4, 256, %s819_s6, %s822_s8  }
  0x2a   : > { %p504_p13 = scmp.ge.s32.totalorder %s728_s17, 1  ;;  %p224_p2 = scmp.lt.s32.totalorder %s728_s17, 3 }
  0x2b   : > { %s495_s9 = sshll.u32 %s805_s24, 3  ;;  %s512_s11 = sshll.u32 %s724_s16, 7 }
  0x2c   : > { %p854_p3 = pnand %p504_p13, %p224_p2  ;;  %s863_s21 = scalar_lea.hbm %s959_s0, %s512_s11 }
  0x2d   : > { %s165_s27 = scalar_lea.vmem [#allocation2], %s495_s9  ;;  %s514_s4 = sshll.u32 %s724_s16, 9 }
  0x2e   : > { %s967_s5 = scalar_select %p854_p3, 1, 0 }
  0x2f   : > { %s175_s26 = sshll.u32 %s165_s27, 4  ;;  %s162_s6 = scalar_lea.sflag [#allocation3], %s805_s24  ;;  %s865_s26 = int_to_ptr.vmem [resolvable:$true] %s175_s26 }
  0x30   : > { %s614_s28 = scalar_lea.hbm %s863_s21, 128  ;;  %s619_s11 = scalar_lea.hbm %s959_s0, 256 }
  0x31   : > { %p615_p7 = scmp.ne.s32.totalorder %s863_s21, %s614_s28  ;;  %p620_p6 = scmp.lt.u32.totalorder %s863_s21, %s959_s0 }
  0x32   : > { %p621_p8 = scmp.lt.u32.totalorder %s619_s11, %s614_s28  ;;  %p623_p12 = scmp.lt.u32.totalorder %s614_s28, %s863_s21 }
  0x33   : > { %p617_p4 = pnand %p615_p7, %p828_p11 }
  0x34   : > { %p622_p10 = por %p621_p8, %p620_p6 }
  0x35   : > { %p618_p5 = pneg %p617_p4 }
  0x36   : > { %p624_p0 = por %p623_p12, %p622_p10 }
  0x38   : > { %p625_p1 = pnand %p624_p0, %p618_p5 }
  0x3a   : > { %628 = shalt.err (!%p625_p1)
}
  0x3b   : > { %s629_s9 = scalar_lea.vmem %s865_s26, 128  ;;  %s731_s27 = smov [#allocation2]  }
  0x3c   : > { %p630_p13 = scmp.ne.s32.totalorder %s865_s26, %s629_s9  ;;  %s634_s29 = sshll.u32 %s731_s27, 4  ;;  %s635_s29 = int_to_ptr.vmem [resolvable:$false] %s634_s29 }
  0x3d   : > { %s636_s30 = scalar_lea.vmem %s635_s29, 256  ;;  %p637_p4 = scmp.lt.s32.totalorder %s865_s26, %s635_s29 }
  0x3e   : > { %p632_p2 = pnand %p630_p13, %p828_p11  ;;  %p638_p3 = scmp.lt.s32.totalorder %s636_s30, %s629_s9 }
  0x40   : > { %p633_p7 = pneg %p632_p2  ;;  %p639_p6 = por %p638_p3, %p637_p4 }
  0x42   : > { %p640_p8 = pnand %p639_p6, %p633_p7 }
  0x44   : > { %643 = shalt.err (!%p640_p8)
}
  0x45   : > { %525 = dma.hbm_to_vmem [thread:$0]  (!%p807_p9), %s863_s21, 128, %s865_s26, %s162_s6  }
  0x46   : > { %s895_s12 = scalar_lea.hbm %s961_s2, %s514_s4  ;;  %s207_s20 = scalar_lea.vmem [#allocation6], %s501_s7 }
  0x47   : > { %s216_s9 = sshll.u32 %s207_s20, 4  ;;  %s644_s27 = scalar_lea.hbm %s895_s12, 512  ;;  %s899_s9 = int_to_ptr.vmem [resolvable:$true] %s216_s9 }
  0x48   : > { %p645_p3 = scmp.ne.s32.totalorder %s895_s12, %s644_s27  ;;  %s649_s6 = scalar_lea.hbm %s961_s2, 1024 }
  0x49   : > { %p650_p12 = scmp.lt.u32.totalorder %s895_s12, %s961_s2  ;;  %p651_p0 = scmp.lt.u32.totalorder %s649_s6, %s644_s27 }
  0x4a   : > { %p647_p5 = pnand %p645_p3, %p828_p11  ;;  %p653_p13 = scmp.lt.u32.totalorder %s644_s27, %s895_s12 }
  0x4b   : > { %p652_p1 = por %p651_p0, %p650_p12 }
  0x4c   : > { %p648_p10 = pneg %p647_p5 }
  0x4d   : > { %p654_p2 = por %p653_p13, %p652_p1 }
  0x4f   : > { %p655_p7 = pnand %p654_p2, %p648_p10 }
  0x51   : > { %658 = shalt.err (!%p655_p7)
}
  0x52   : > { %s659_s24 = scalar_lea.vmem %s899_s9, 512  ;;  %s732_s7 = smov [#allocation6]  }
  0x53   : > { %p660_p4 = scmp.ne.s32.totalorder %s899_s9, %s659_s24  ;;  %s664_s30 = sshll.u32 %s732_s7, 4  ;;  %s665_s30 = int_to_ptr.vmem [resolvable:$false] %s664_s30 }
  0x54   : > { %s666_s28 = scalar_lea.vmem %s665_s30, 1024  ;;  %p667_p3 = scmp.lt.s32.totalorder %s899_s9, %s665_s30 }
  0x55   : > { %p662_p6 = pnand %p660_p4, %p828_p11  ;;  %p668_p5 = scmp.lt.s32.totalorder %s666_s28, %s659_s24 }
  0x57   : > { %p663_p8 = pneg %p662_p6  ;;  %p669_p12 = por %p668_p5, %p667_p3 }
  0x59   : > { %p670_p0 = pnand %p669_p12, %p663_p8 }
  0x5b   : > { %673 = shalt.err (!%p670_p0)
}
  0x5c   : > { %s733_s11 = smov 256   ;;  %s734_s20 = smov 16  }
  0x5d   : > { %531 = dma.hbm_to_vmem [thread:$0]  (!%p807_p9), %s895_s12, 512, %s899_s9, %s822_s8, %s733_s11, %s733_s11, %s734_s20  }
  0x5e   : > { %p968_p11 = scmp.ne.s32.totalorder %s967_s5, 0 }
  0x5f   : > { %s230_s10 = sand.u32 (!%p968_p11), 1, %s712_s13   ;;  %p969_p10 = scmp.ne.s32.totalorder (!%p968_p11), %s964_s22, 0 }
  0x60   : > { %228 = sbr.rel (%p968_p11) target bundleno = 117 (0x75), region = 32  ;;  %s505_s27 = sshll.u32 (!%p968_p11), %s230_s10, 3 }
  0x61   : > { %s231_s21 = scalar_lea.sflag (!%p968_p11), [#allocation3], %s230_s10  ;;  %s234_s26 = scalar_lea.vmem (!%p968_p11), [#allocation2], %s505_s27 }
  0x67   : > { %699 = dma.done.wait (%p969_p10), %s231_s21, 128  }
  0x68   : > { %701 = vsyncadd (%p969_p10), %s231_s21, 4294967168  ;;  %s239_s6 = sand.u32 1, %s491_s18   ;;  %s506_s25 = sshll.u32 %s230_s10, 4 }
  0x69   : > { %s240_s8 = scalar_lea.sflag [#allocation5], %s239_s6  ;;  %s243_s12 = scalar_lea.vmem [#allocation4], %s506_s25 }
  0x6a   : > { %703 = dma.done.wait (%p969_p10), %s240_s8, 768  }
  0x6b   : > { %705 = vsyncadd (%p969_p10), %s240_s8, 4294966528  ;;  %p293_p9 = scmp.lt.s32.totalorder %s720_s15, 1  ;;  %s507_s5 = sshll.u32 %s230_s10, 5  ;;  %v302_v0 = vld [vmem:[%s234_s26] sm:$0xff]  ;;  %v308_v1 = vld [vmem:[%s243_s12] sm:$0xff]  ;;  %vm328_vm0 = vcmask 1043456  }
  0x6c   : > { %v309_v2 = vld [vmem:[%s243_s12 + $0x8] sm:$0xff]  ;;  %v304_v3 = vcombine.high %v302_v0, %v302_v0  ;;  %v312_v4 = vrot.slane %v308_v1, 4  ;;  %s252_s18 = scalar_lea.vmem [#allocation6], %s507_s5 }
  0x6d   : > { %s978_s15 = smov (!%p293_p9, %s720_s15), 1  ;;  %v313_v5 = vrot.slane %v309_v2, 4  ;;  %v320_v6 = vld [vmem:[%s252_s18] sm:$0xff]  ;;  %v321_v7 = vld [vmem:[%s252_s18 + $0x8] sm:$0xff]  ;;  %v322_v8 = vld [vmem:[%s252_s18 + $0x10] sm:$0xff] }
  0x6e   : > { %s515_s9 = sshll.u32 %s978_s15, 6  ;;  %v329_v9 = vrot.slane %v320_v6, 4  ;;  %v330_v10 = vrot.slane %v321_v7, 4  ;;  %v331_v11 = vrot.slane %v322_v8, 4  ;;  %v323_v12 = vld [vmem:[%s252_s18 + $0x18] sm:$0xff] }
  0x6f   : > { %s300_s24 = scalar_lea.vmem %s962_s3, %s515_s9  ;;  %v333_v13 = vrot.slane %v323_v12, 4 }
  0x70   : > { %306 = vst [vmem:[%s300_s24] sm:$0xf] %v302_v0  ;;  %307 = vst [vmem:[%s300_s24 + $0x8] sm:$0xf] %v304_v3  ;;  %v332_v14 = vsel %vm328_vm0, %v329_v9, %v331_v11 }
  0x71   : > { %316 = vst [vmem:[%s300_s24 + $0x10] ss:$-12 sps:$4 sm:$0xff] %v312_v4   ;;  %317 = vst [vmem:[%s300_s24 + $0x18] ss:$-12 sps:$4 sm:$0xff] %v313_v5   ;;  %v334_v15 = vsel %vm328_vm0, %v330_v10, %v333_v13 }
  0x72   : > { %341 = vst [vmem:[%s300_s24 + $0x10] sm:$0xf0] %v329_v9  ;;  %342 = vst [vmem:[%s300_s24 + $0x18] sm:$0xf0] %v330_v10 }
  0x73   : > { %345 = vst [vmem:[%s300_s24 + $0x30] sm:$0xf] %v331_v11  ;;  %343 = vst [vmem:[%s300_s24 + $0x20] sm:$0xff] %v332_v14 }
  0x74   : > { %346 = vst [vmem:[%s300_s24 + $0x38] sm:$0xf] %v333_v13  ;;  %344 = vst [vmem:[%s300_s24 + $0x28] sm:$0xff] %v334_v15 }
  0x75 PF: > { %s19_s17 = sadd.s32 1, %s728_s17   ;;  %s970_s12 = smov %s712_s13 }
  0x76   : > { %p16_p1 = scmp.ge.s32.totalorder %s19_s17, 4   ;;  %s971_s13 = smov %s716_s14 }
  0x77   : > { %s972_s14 = smov %s802_s23  ;;  %s973_s15 = smov %s724_s16 }
  0x78   : > { %s974_s16 = smov %s976_s19  ;;  %18 = sbr.rel (!%p16_p1) target bundleno = 6 (0x6), region = 96 }
  0x7f   :  { %377 = vsyncpa [#allocation3], 1 }
  0x80   :  { %379 = vsyncpa [#allocation3 + $0x1], 1 }
  0x81   :  { %380 = vsyncpa [#allocation5], 1 }
  0x82   :  { %382 = vsyncpa [#allocation5 + $0x1], 1 }

</bundles_post_ra>
